<compile_context>
chip_gen: v7x
topology: tpu7x:2x2x1
jax: 0.10.0
libtpu: 0.0.40
codegen_flags: <defaults>
</compile_context>

<pallas_src>
import functools

import jax
import jax.numpy as jnp
import numpy as np
from jax.experimental import pallas as pl
from jax.experimental.pallas import tpu as pltpu

OUT_PAD = 128  # lane-dense padded output width of the head (>= 9)


# ----------------------------- chip config ------------------------------------------
def _chip_config():
    try:
        kind = jax.devices()[0].device_kind.lower()
    except Exception:
        kind = ""
    older = any(t in kind for t in ("v2", "v3", "v4", "v5"))   # no bf16 VPU
    is_v7 = "v7" in kind
    return dict(
        bf16_elementwise=not older,     # v6e/v7x: bf16-capable VALU
        conv1_on_vpu=older,             # v5e: reclaim the K=3 MXU pass
        tile_n=2048,
        vmem_limit=(32 << 20) if is_v7 else (64 << 20),
    )


def _round_up(v, m):
    return (v + m - 1) // m * m


# ----------------------------- Pallas kernels ----------------------------------------
def _stn3d_point_kernel(x_ref,
                        w1_ref, b1_ref, w2_ref, b2_ref, w3_ref, b3_ref,
                        pool_ref, *, bf16_elementwise, conv1_on_vpu):
    """Point-wise MLP (conv1..conv3 + folded BN + ReLU) + running max-pool.

    pool_ref is the (8, 1024) output block, resident across the point-tile axis;
    it acts as the accumulator (init at pt == 0, per-vreg VALU max fold per tile).
    """
    pt = pl.program_id(1)
    ew = jnp.bfloat16 if bf16_elementwise else jnp.float32

    @pl.when(pt == 0)
    def _init():
        pool_ref[...] = jnp.full(pool_ref.shape, -jnp.inf, pool_ref.dtype)

    x = x_ref[...]                                                  # (TILE_N, 3) f32

    if conv1_on_vpu:
        # v5e: K=3 matmul costs nearly a full MXU pass; do 3 broadcast MACs on the VPU.
        w1 = w1_ref[...]                                            # (3, 64) f32
        h = (x[:, 0:1] * w1[0:1, :]
             + x[:, 1:2] * w1[1:2, :]
             + x[:, 2:3] * w1[2:3, :]) + b1_ref[...]
        h = jnp.maximum(h, 0.0)
    else:
        h = jnp.dot(x.astype(jnp.bfloat16), w1_ref[...],
                    preferred_element_type=jnp.float32)
        h = jnp.maximum(h.astype(ew) + b1_ref[...], 0.0)
    h = h.astype(jnp.bfloat16)                                      # (TILE_N, 64)

    h = jnp.dot(h, w2_ref[...], preferred_element_type=jnp.float32)
    h = jnp.maximum(h.astype(ew) + b2_ref[...], 0.0).astype(jnp.bfloat16)  # (TILE_N, 128)

    h = jnp.dot(h, w3_ref[...], preferred_element_type=jnp.float32)
    h = jnp.maximum(h.astype(ew) + b3_ref[...], 0.0)                # (TILE_N, 1024), ew

    # Per-vreg VALU max fold (no cross-sublane XLU reduce per tile): group rows in
    # sublane-aligned slabs of 8 and max across slabs.
    tn, c = h.shape
    h8 = jnp.max(h.reshape(tn // 8, 8, c), axis=0)                  # (8, 1024)
    pool_ref[...] = jnp.maximum(pool_ref[...], h8.astype(jnp.float32))


def _stn3d_head_kernel(pool_ref, w4_ref, b4_ref, w5_ref, b5_ref, w6_ref, b6_ref,
                       out_ref):
    """Batched FC head: single 8->1 cross-sublane reduce, then fc1/fc2/fc3 with M=B."""
    pooled = jnp.max(pool_ref[...], axis=1)                         # (B, 1024) f32
    f = jnp.dot(pooled.astype(jnp.bfloat16), w4_ref[...],
                preferred_element_type=jnp.float32) + b4_ref[...]
    f = jnp.maximum(f, 0.0)                                         # (B, 512)
    f = jnp.dot(f.astype(jnp.bfloat16), w5_ref[...],
                preferred_element_type=jnp.float32) + b5_ref[...]
    f = jnp.maximum(f, 0.0)                                         # (B, 256)
    out_ref[...] = jnp.dot(f.astype(jnp.bfloat16), w6_ref[...],
                           preferred_element_type=jnp.float32) + b6_ref[...]  # (B, 128)


# ----------------------------- parameters / BN folding -------------------------------
def _fold_bn(w, b, gamma, beta, mean, var, eps=1e-5):
    """Fold inference-mode BatchNorm into (w, b). w: (Cout, Cin), b: (Cout,)."""
    scale = gamma / jnp.sqrt(var + eps)
    w_f = w * scale[:, None]
    b_f = (b - mean) * scale + beta
    return w_f, b_f


def init_params(key):
    """Deterministic parameter init matching STN3d.__init__ shapes."""
    ks = jax.random.split(key, 32)
    i = iter(range(32))

    def lin(cout, cin):
        kw, kb = ks[next(i)], ks[next(i)]
        bound = 1.0 / np.sqrt(cin)
        w = jax.random.uniform(kw, (cout, cin), jnp.float32, -bound, bound)
        b = jax.random.uniform(kb, (cout,), jnp.float32, -bound, bound)
        return w, b

    def bn(c):
        kg, kb, km = ks[next(i)], ks[next(i)], ks[next(i)]
        gamma = 1.0 + 0.1 * jax.random.normal(kg, (c,), jnp.float32)
        beta = 0.1 * jax.random.normal(kb, (c,), jnp.float32)
        mean = 0.1 * jax.random.normal(km, (c,), jnp.float32)
        var = jnp.ones((c,), jnp.float32) * 0.9
        return gamma, beta, mean, var

    p = {}
    p["conv1"] = lin(64, 3)
    p["conv2"] = lin(128, 64)
    p["conv3"] = lin(1024, 128)
    p["fc1"] = lin(512, 1024)
    p["fc2"] = lin(256, 512)
    p["fc3"] = lin(9, 256)
    p["bn1"] = bn(64)
    p["bn2"] = bn(128)
    p["bn3"] = bn(1024)
    p["bn4"] = bn(512)
    p["bn5"] = bn(256)
    return p


def _folded_weights(params):
    w1, b1 = _fold_bn(*params["conv1"], *params["bn1"])
    w2, b2 = _fold_bn(*params["conv2"], *params["bn2"])
    w3, b3 = _fold_bn(*params["conv3"], *params["bn3"])
    w4, b4 = _fold_bn(*params["fc1"], *params["bn4"])
    w5, b5 = _fold_bn(*params["fc2"], *params["bn5"])
    w6, b6 = params["fc3"]
    iden = jnp.array([1, 0, 0, 0, 1, 0, 0, 0, 1], jnp.float32)
    b6 = b6 + iden  # fold the identity addition into the last bias
    return (w1, b1), (w2, b2), (w3, b3), (w4, b4), (w5, b5), (w6, b6)


# ----------------------------- JAX glue ----------------------------------------------
def stn3d_forward(x, params, *, tile_n=None, bf16_elementwise=None, conv1_on_vpu=None):
    """x: (B, 3, N) float32  ->  (B, 3, 3) float32."""
    cfg = _chip_config()
    if tile_n is None:
        tile_n = cfg["tile_n"]
    if bf16_elementwise is None:
        bf16_elementwise = cfg["bf16_elementwise"]
    if conv1_on_vpu is None:
        conv1_on_vpu = cfg["conv1_on_vpu"]
    ew = jnp.bfloat16 if bf16_elementwise else jnp.float32

    B, C, N = x.shape
    assert C == 3

    (w1, b1), (w2, b2), (w3, b3), (w4, b4), (w5, b5), (w6, b6) = _folded_weights(params)

    def wt(w, dtype=jnp.bfloat16):   # (Cout, Cin) -> (Cin, Cout)
        return jnp.transpose(w).astype(dtype)

    def row(b, dtype):               # bias as a (1, C) row (lane-axis broadcast)
        return b.reshape(1, -1).astype(dtype)

    w1_dt = jnp.float32 if conv1_on_vpu else jnp.bfloat16
    b1_dt = jnp.float32 if conv1_on_vpu else ew
    point_weights = (wt(w1, w1_dt), row(b1, b1_dt),
                     wt(w2), row(b2, ew),
                     wt(w3), row(b3, ew))

    # Channels-last layout (B, N_pad, 3); pad points by replicating point 0 of each
    # cloud — exact for the max-pool (duplicates never change a max).
    x_cl = jnp.transpose(x, (0, 2, 1)).astype(jnp.float32)
    tile = _round_up(min(tile_n, _round_up(N, 16)), 16)   # multiple of 16: clean bf16 packing
    n_pad = _round_up(N, tile)
    if n_pad != N:
        pad = jnp.broadcast_to(x_cl[:, :1, :], (B, n_pad - N, 3))
        x_cl = jnp.concatenate([x_cl, pad], axis=1)
    n_tiles = n_pad // tile

    x_spec = pl.BlockSpec((pl.Squeezed(), tile, 3), lambda b, p: (b, p, 0))

    # Weights: full-array blocks with constant index maps -> stay resident in VMEM.
    # TODO(synk): pipeline_mode=pl.Buffered(1) here would drop the redundant second
    # buffer (~VMEM saving on v7x); left at the default for portability.
    def const_spec(arr):
        nd = arr.ndim
        return pl.BlockSpec(arr.shape, lambda b, p, _nd=nd: (0,) * _nd)

    in_specs = [x_spec] + [const_spec(a) for a in point_weights]
    # Pooling accumulator = resident output block (8, 1024), same index across tiles.
    out_specs = pl.BlockSpec((pl.Squeezed(), 8, 1024), lambda b, p: (b, 0, 0))

    flops = 2 * B * n_pad * (3 * 64 + 64 * 128 + 128 * 1024)
    bytes_accessed = (x_cl.size * 4
                      + sum(int(a.size) * a.dtype.itemsize for a in point_weights)
                      + B * 8 * 1024 * 4)

    kernel = functools.partial(_stn3d_point_kernel,
                               bf16_elementwise=bf16_elementwise,
                               conv1_on_vpu=conv1_on_vpu)

    pool = pl.pallas_call(
        kernel,
        out_shape=jax.ShapeDtypeStruct((B, 8, 1024), jnp.float32),
        grid_spec=pltpu.PrefetchScalarGridSpec(
            num_scalar_prefetch=0,
            grid=(B, n_tiles),
            in_specs=in_specs,
            out_specs=out_specs,
        ),
        compiler_params=pltpu.CompilerParams(
            dimension_semantics=("parallel", "arbitrary"),
            vmem_limit_bytes=cfg["vmem_limit"],
        ),
        cost_estimate=pl.CostEstimate(flops=flops, transcendentals=0,
                                      bytes_accessed=bytes_accessed),
    )(x_cl, *point_weights)

    # FC head: one batched (M=B) pallas_call — fills MXU sublanes and keeps the hot
    # point loop free of the cold fc path and fc weights.  Last layer padded to 128
    # lanes for a dense store; wrapper slices the first 9 lanes.
    w6p = jnp.zeros((256, OUT_PAD), jnp.float32).at[:, :9].set(jnp.transpose(w6))
    b6p = jnp.zeros((1, OUT_PAD), jnp.float32).at[0, :9].set(b6)
    out = pl.pallas_call(
        _stn3d_head_kernel,
        out_shape=jax.ShapeDtypeStruct((B, OUT_PAD), jnp.float32),
    )(pool, wt(w4), row(b4, jnp.float32), wt(w5), row(b5, jnp.float32),
      w6p.astype(jnp.bfloat16), b6p)

    return out[:, :9].reshape(B, 3, 3)


def stn3d_reference(x, params, *, bf16_elementwise=None, conv1_on_vpu=None):
    """Pure-JAX reference matching the kernel's generation-conditional numerics."""
    cfg = _chip_config()
    if bf16_elementwise is None:
        bf16_elementwise = cfg["bf16_elementwise"]
    if conv1_on_vpu is None:
        conv1_on_vpu = cfg["conv1_on_vpu"]
    ew = jnp.bfloat16 if bf16_elementwise else jnp.float32

    (w1, b1), (w2, b2), (w3, b3), (w4, b4), (w5, b5), (w6, b6) = _folded_weights(params)

    def mm_relu(a, w, b):
        acc = jnp.dot(a.astype(jnp.bfloat16), jnp.transpose(w).astype(jnp.bfloat16),
                      preferred_element_type=jnp.float32)
        return jnp.maximum(acc.astype(ew) + b.astype(ew), 0.0)

    h = jnp.transpose(x, (0, 2, 1)).astype(jnp.float32)             # (B, N, 3)
    if conv1_on_vpu:
        h = jnp.maximum(jnp.dot(h, jnp.transpose(w1)) + b1, 0.0)    # pure f32 conv1
    else:
        h = mm_relu(h, w1, b1)
    h = mm_relu(h, w2, b2)
    h = mm_relu(h, w3, b3)
    pooled = jnp.max(h, axis=1).astype(jnp.float32)                 # (B, 1024)

    def head(a, w, b):
        return jnp.dot(a.astype(jnp.bfloat16), jnp.transpose(w).astype(jnp.bfloat16),
                       preferred_element_type=jnp.float32) + b

    f = jax.nn.relu(head(pooled, w4, b4))
    f = jax.nn.relu(head(f, w5, b5))
    out = head(f, w6, b6)                                           # identity folded
    return out.reshape(-1, 3, 3)


if __name__ == "__main__":
    key = jax.random.PRNGKey(0)
    k_param, k_x = jax.random.split(key)

    # Small shapes: B=2, N=40 points.
    B, N = 2, 40
    params = init_params(k_param)
    x = jax.random.normal(k_x, (B, 3, N), jnp.float32)

    y_ref = stn3d_reference(x, params)

    # tile_n=16 -> N padded to 48, 3 point tiles: exercises padding, multi-tile
    # running-max accumulation and the pl.when init path.
    y_small = jax.block_until_ready(stn3d_forward(x, params, tile_n=16))
    np.testing.assert_allclose(np.asarray(y_small), np.asarray(y_ref), rtol=2e-2, atol=2e-2)

    # Default tile (single tile here): exercises the one-tile path.
    y_default = jax.block_until_ready(stn3d_forward(x, params))
    np.testing.assert_allclose(np.asarray(y_default), np.asarray(y_ref), rtol=2e-2, atol=2e-2)

    assert y_small.shape == (B, 3, 3) and y_default.shape == (B, 3, 3)
    print("KERNEL_OK")
</pallas_src>

<mosaic_0001>
module attributes {stable_mosaic.version = 11 : i64} {
  func.func @_stn3d_point_kernel(%arg0: i32, %arg1: i32, %arg2: memref<1x16x3xf32, #tpu.memory_space<vmem>>, %arg3: memref<3x64xbf16, #tpu.memory_space<vmem>>, %arg4: memref<1x64xbf16, #tpu.memory_space<vmem>>, %arg5: memref<64x128xbf16, #tpu.memory_space<vmem>>, %arg6: memref<1x128xbf16, #tpu.memory_space<vmem>>, %arg7: memref<128x1024xbf16, #tpu.memory_space<vmem>>, %arg8: memref<1x1024xbf16, #tpu.memory_space<vmem>>, %arg9: memref<1x8x1024xf32, #tpu.memory_space<vmem>>) attributes {dimension_semantics = [#tpu.dimension_semantics<parallel>, #tpu.dimension_semantics<arbitrary>], iteration_bounds = array<i64: 2, 3>, scalar_prefetch = 0 : i64, scratch_operands = 0 : i64, tpu.core_type = #tpu.core_type<tc>, window_params = [{transform_indices = @transform_0, window_bounds = array<i64: 1, 16, 3>}, {pipeline_mode = #tpu.pipeline_mode<synchronous>, transform_indices = @transform_1, window_bounds = array<i64: 3, 64>}, {pipeline_mode = #tpu.pipeline_mode<synchronous>, transform_indices = @transform_2, window_bounds = array<i64: 1, 64>}, {pipeline_mode = #tpu.pipeline_mode<synchronous>, transform_indices = @transform_3, window_bounds = array<i64: 64, 128>}, {pipeline_mode = #tpu.pipeline_mode<synchronous>, transform_indices = @transform_4, window_bounds = array<i64: 1, 128>}, {pipeline_mode = #tpu.pipeline_mode<synchronous>, transform_indices = @transform_5, window_bounds = array<i64: 128, 1024>}, {pipeline_mode = #tpu.pipeline_mode<synchronous>, transform_indices = @transform_6, window_bounds = array<i64: 1, 1024>}, {transform_indices = @transform_7, window_bounds = array<i64: 1, 8, 1024>}]} {
    %c0_i32 = arith.constant 0 : i32
    %0 = arith.cmpi eq, %arg1, %c0_i32 : i32
    %1 = arith.extui %0 : i1 to i32
    %c0_i32_0 = arith.constant 0 : i32
    %2 = arith.cmpi ne, %1, %c0_i32_0 : i32
    scf.if %2 {
      %cst_27 = arith.constant 0xFF800000 : f32
      %39 = vector.broadcast %cst_27 : f32 to vector<8x1024xf32>
      %c0_28 = arith.constant 0 : index
      %c0_29 = arith.constant 0 : index
      %c0_30 = arith.constant 0 : index
      %40 = vector.load %arg9[%c0_28, %c0_29, %c0_30] : memref<1x8x1024xf32, #tpu.memory_space<vmem>>, vector<1x8x1024xf32>
      %41 = vector.shape_cast %40 : vector<1x8x1024xf32> to vector<8x1024xf32>
      %42 = vector.shape_cast %39 : vector<8x1024xf32> to vector<1x8x1024xf32>
      tpu.vector_store %arg9[%c0_28, %c0_29, %c0_30], %42 {strides = array<i32>} : memref<1x8x1024xf32, #tpu.memory_space<vmem>>, vector<1x8x1024xf32>,
    } else {
    }
    %c0 = arith.constant 0 : index
    %c0_1 = arith.constant 0 : index
    %c0_2 = arith.constant 0 : index
    %3 = vector.load %arg2[%c0, %c0_1, %c0_2] : memref<1x16x3xf32, #tpu.memory_space<vmem>>, vector<1x16x3xf32>
    %4 = vector.shape_cast %3 : vector<1x16x3xf32> to vector<16x3xf32>
    %5 = arith.truncf %4 : vector<16x3xf32> to vector<16x3xbf16>
    %c0_3 = arith.constant 0 : index
    %c0_4 = arith.constant 0 : index
    %6 = vector.load %arg3[%c0_3, %c0_4] : memref<3x64xbf16, #tpu.memory_space<vmem>>, vector<3x64xbf16>
    %cst = arith.constant dense<0.000000e+00> : vector<16x64xf32>
    %7 = tpu.matmul %5, %6, %cst {dimension_numbers = #tpu.dot_dimension_numbers<[1], [0], [0], [1], [0, 0, 1, 1], [], []>} : vector<16x3xbf16>, vector<3x64xbf16>, vector<16x64xf32> -> vector<16x64xf32>
    %8 = arith.truncf %7 : vector<16x64xf32> to vector<16x64xbf16>
    %c0_5 = arith.constant 0 : index
    %c0_6 = arith.constant 0 : index
    %9 = vector.load %arg4[%c0_5, %c0_6] : memref<1x64xbf16, #tpu.memory_space<vmem>>, vector<1x64xbf16>
    %10 = vector.broadcast %9 : vector<1x64xbf16> to vector<16x64xbf16>
    %11 = arith.addf %8, %10 : vector<16x64xbf16>
    %cst_7 = arith.constant 0.000000e+00 : bf16
    %12 = vector.broadcast %cst_7 : bf16 to vector<16x64xbf16>
    %13 = arith.maximumf %11, %12 : vector<16x64xbf16>
    %c0_8 = arith.constant 0 : index
    %c0_9 = arith.constant 0 : index
    %14 = vector.load %arg5[%c0_8, %c0_9] : memref<64x128xbf16, #tpu.memory_space<vmem>>, vector<64x128xbf16>
    %cst_10 = arith.constant dense<0.000000e+00> : vector<16x128xf32>
    %15 = tpu.matmul %13, %14, %cst_10 {dimension_numbers = #tpu.dot_dimension_numbers<[1], [0], [0], [1], [0, 0, 1, 1], [], []>} : vector<16x64xbf16>, vector<64x128xbf16>, vector<16x128xf32> -> vector<16x128xf32>
    %16 = arith.truncf %15 : vector<16x128xf32> to vector<16x128xbf16>
    %c0_11 = arith.constant 0 : index
    %c0_12 = arith.constant 0 : index
    %17 = vector.load %arg6[%c0_11, %c0_12] : memref<1x128xbf16, #tpu.memory_space<vmem>>, vector<1x128xbf16>
    %18 = vector.broadcast %17 : vector<1x128xbf16> to vector<16x128xbf16>
    %19 = arith.addf %16, %18 : vector<16x128xbf16>
    %cst_13 = arith.constant 0.000000e+00 : bf16
    %20 = vector.broadcast %cst_13 : bf16 to vector<16x128xbf16>
    %21 = arith.maximumf %19, %20 : vector<16x128xbf16>
    %c0_14 = arith.constant 0 : index
    %c0_15 = arith.constant 0 : index
    %22 = vector.load %arg7[%c0_14, %c0_15] : memref<128x1024xbf16, #tpu.memory_space<vmem>>, vector<128x1024xbf16>
    %cst_16 = arith.constant dense<0.000000e+00> : vector<16x1024xf32>
    %23 = tpu.matmul %21, %22, %cst_16 {dimension_numbers = #tpu.dot_dimension_numbers<[1], [0], [0], [1], [0, 0, 1, 1], [], []>} : vector<16x128xbf16>, vector<128x1024xbf16>, vector<16x1024xf32> -> vector<16x1024xf32>
    %24 = arith.truncf %23 : vector<16x1024xf32> to vector<16x1024xbf16>
    %c0_17 = arith.constant 0 : index
    %c0_18 = arith.constant 0 : index
    %25 = vector.load %arg8[%c0_17, %c0_18] : memref<1x1024xbf16, #tpu.memory_space<vmem>>, vector<1x1024xbf16>
    %26 = vector.broadcast %25 : vector<1x1024xbf16> to vector<16x1024xbf16>
    %27 = arith.addf %24, %26 : vector<16x1024xbf16>
    %cst_19 = arith.constant 0.000000e+00 : bf16
    %28 = vector.broadcast %cst_19 : bf16 to vector<16x1024xbf16>
    %29 = arith.maximumf %27, %28 : vector<16x1024xbf16>
    %30 = vector.shape_cast %29 : vector<16x1024xbf16> to vector<2x8x1024xbf16>
    %cst_20 = arith.constant dense<0xFF80> : vector<8x1024xbf16>
    %31 = vector.multi_reduction <maximumf>, %30, %cst_20 [0] : vector<2x8x1024xbf16> to vector<8x1024xbf16>
    %c0_21 = arith.constant 0 : index
    %c0_22 = arith.constant 0 : index
    %c0_23 = arith.constant 0 : index
    %32 = vector.load %arg9[%c0_21, %c0_22, %c0_23] : memref<1x8x1024xf32, #tpu.memory_space<vmem>>, vector<1x8x1024xf32>
    %33 = vector.shape_cast %32 : vector<1x8x1024xf32> to vector<8x1024xf32>
    %34 = arith.extf %31 : vector<8x1024xbf16> to vector<8x1024xf32>
    %35 = arith.maximumf %33, %34 : vector<8x1024xf32>
    %c0_24 = arith.constant 0 : index
    %c0_25 = arith.constant 0 : index
    %c0_26 = arith.constant 0 : index
    %36 = vector.load %arg9[%c0_24, %c0_25, %c0_26] : memref<1x8x1024xf32, #tpu.memory_space<vmem>>, vector<1x8x1024xf32>
    %37 = vector.shape_cast %36 : vector<1x8x1024xf32> to vector<8x1024xf32>
    %38 = vector.shape_cast %35 : vector<8x1024xf32> to vector<1x8x1024xf32>
    tpu.vector_store %arg9[%c0_24, %c0_25, %c0_26], %38 {strides = array<i32>} : memref<1x8x1024xf32, #tpu.memory_space<vmem>>, vector<1x8x1024xf32>,
    return
  }
  func.func @transform_0(%arg0: i32, %arg1: i32) -> (i32, i32, i32) {
    %c0_i32 = arith.constant 0 : i32
    %c0_i32_0 = arith.constant 0 : i32
    return %arg0, %arg1, %c0_i32 : i32, i32, i32
  }
  func.func @transform_1(%arg0: i32, %arg1: i32) -> (i32, i32) {
    %c0_i32 = arith.constant 0 : i32
    %c0_i32_0 = arith.constant 0 : i32
    %c0_i32_1 = arith.constant 0 : i32
    return %c0_i32, %c0_i32_0 : i32, i32
  }
  func.func @transform_2(%arg0: i32, %arg1: i32) -> (i32, i32) {
    %c0_i32 = arith.constant 0 : i32
    %c0_i32_0 = arith.constant 0 : i32
    %c0_i32_1 = arith.constant 0 : i32
    return %c0_i32, %c0_i32_0 : i32, i32
  }
  func.func @transform_3(%arg0: i32, %arg1: i32) -> (i32, i32) {
    %c0_i32 = arith.constant 0 : i32
    %c0_i32_0 = arith.constant 0 : i32
    %c0_i32_1 = arith.constant 0 : i32
    return %c0_i32, %c0_i32_0 : i32, i32
  }
  func.func @transform_4(%arg0: i32, %arg1: i32) -> (i32, i32) {
    %c0_i32 = arith.constant 0 : i32
    %c0_i32_0 = arith.constant 0 : i32
    %c0_i32_1 = arith.constant 0 : i32
    return %c0_i32, %c0_i32_0 : i32, i32
  }
  func.func @transform_5(%arg0: i32, %arg1: i32) -> (i32, i32) {
    %c0_i32 = arith.constant 0 : i32
    %c0_i32_0 = arith.constant 0 : i32
    %c0_i32_1 = arith.constant 0 : i32
    return %c0_i32, %c0_i32_0 : i32, i32
  }
  func.func @transform_6(%arg0: i32, %arg1: i32) -> (i32, i32) {
    %c0_i32 = arith.constant 0 : i32
    %c0_i32_0 = arith.constant 0 : i32
    %c0_i32_1 = arith.constant 0 : i32
    return %c0_i32, %c0_i32_0 : i32, i32
  }
  func.func @transform_7(%arg0: i32, %arg1: i32) -> (i32, i32, i32) {
    %c0_i32 = arith.constant 0 : i32
    %c0_i32_0 = arith.constant 0 : i32
    %c0_i32_1 = arith.constant 0 : i32
    return %arg0, %c0_i32, %c0_i32_0 : i32, i32, i32
  }
}

</mosaic_0001>

<bundles_post_ra>
// kernel: tpu_custom_call.1
= control target key start
LH: loop header
LB: loop body
LE: loop exit
PB: predicated region body
PF: predicated region fallthrough
CT: control target
= control target key end

     0   :  { %s2642_s0 = inlined_call_operand.hbm [shape: f32[2,48,3], index: 0, kind: input, shape index: {}]   ;;  %s2643_s1 = inlined_call_operand.hbm [shape: bf16[3,64], index: 1, kind: input, shape index: {}]   ;;  %s2644_s2 = inlined_call_operand.hbm [shape: bf16[1,64], index: 2, kind: input, shape index: {}]   ;;  %s2645_s3 = inlined_call_operand.hbm [shape: bf16[64,128], index: 3, kind: input, shape index: {}]   ;;  %s2646_s4 = inlined_call_operand.hbm [shape: bf16[1,128], index: 4, kind: input, shape index: {}]   ;;  %s2647_s5 = inlined_call_operand.hbm [shape: bf16[128,1024], index: 5, kind: input, shape index: {}]   ;;  %s2648_s6 = inlined_call_operand.hbm [shape: bf16[1,1024], index: 6, kind: input, shape index: {}]   ;;  %s2649_s7 = inlined_call_operand.hbm [shape: f32[2,8,1024], index: 7, kind: output, shape index: {}]  }
   0x1   :  { %2658 = sst [smem:[#allocation24_spill]] %s2642_s0 }
   0x2   :  { %2659 = sst [smem:[#allocation25_spill]] %s2643_s1 }
   0x3   :  { %2660 = sst [smem:[#allocation26_spill]] %s2644_s2 }
   0x4   :  { %2661 = sst [smem:[#allocation27_spill]] %s2645_s3 }
   0x5   :  { %2662 = sst [smem:[#allocation28_spill]] %s2646_s4 }
   0x6   :  { %2663 = sst [smem:[#allocation29_spill]] %s2649_s7 }
   0x7   :  { %12 = vsyncpa [#allocation3], 0 }
   0x8   :  { %14 = vsyncpa [#allocation3 + $0x1], 0 }
   0x9   :  { %15 = vsyncpa [#allocation6], 0 }
   0xa   :  { %16 = vsyncpa [#allocation9], 0 }
   0xb   :  { %17 = vsyncpa [#allocation12], 0 }
   0xc   :  { %18 = vsyncpa [#allocation4], 0 }
   0xd   :  { %20 = vsyncpa [#allocation4 + $0x1], 0  ;;  %s2187_s24 = smov 0   ;;  %s2189_s25 = smov 0  }
   0xe   :  { %s2191_s26 = smov 0   ;;  %s2193_s27 = smov 0  }
   0xf   :  { %s2195_s28 = smov 0   ;;  %s2197_s29 = smov 0  }
  0x10   :  { %s2199_s30 = smov 0   ;;  %s2201_s8 = smov 0  }
  0x11   :  { %s2203_s9 = smov 0   ;;  %s2205_s10 = smov 0  }
  0x12   :  { %s2207_s11 = smov 0  }
  0x13 LB: > { %2664 = sst [smem:[#allocation20_spill]] %s2085_s24  ;;  %s2650_s12 = sadd.s32 4294967295, %s2125_s11   ;;  %s2125_s11 = sphi %s2207_s11, %s26_s11   ;;  %s2121_s10 = sphi %s2205_s10, %s2703_s10   ;;  %s2117_s9 = sphi %s2203_s9, %s2702_s9   ;;  %s2113_s8 = sphi %s2201_s8, %s2701_s8   ;;  %s2109_s30 = sphi %s2199_s30, %s2700_s30   ;;  %s2105_s29 = sphi %s2197_s29, %s2699_s29   ;;  %s2101_s28 = sphi %s2195_s28, %s2698_s28   ;;  %s2097_s27 = sphi %s2193_s27, %s2697_s27   ;;  %s2093_s26 = sphi %s2191_s26, %s2696_s26   ;;  %s2089_s25 = sphi %s2189_s25, %s2695_s25   ;;  %s2085_s24 = sphi %s2187_s24, %s2694_s24  }
  0x14   : > { %2665 = sst [smem:[#allocation21_spill]] %s2109_s30  ;;  %p1482_p0 = scmp.ge.s32.totalorder %s2125_s11, 1 }
  0x15   : > { %2666 = sst [smem:[#allocation22_spill]] %s2113_s8  ;;  %p2246_p1 = scmp.eq.s32.totalorder %s2650_s12, 0 }
  0x16   : > { %p223_p2 = scmp.lt.s32.totalorder %s2125_s11, 7  ;;  %s2127_s15 = smov [#allocation5]  }
  0x17   : > { %s2667_s13 = scalar_select %p2246_p1, 1, 0 }
  0x18   : > { %p2251_p3 = pnand %p1482_p0, %p223_p2  ;;  %s236_s16 = sshll.u32 %s2127_s15, 4  ;;  %s237_s16 = int_to_ptr.vmem [resolvable:$true] %s236_s16 }
  0x19   : > { %s2128_s17 = smov [#allocation8]   ;;  %s2129_s20 = smov [#allocation11]  }
  0x1a   : > { %s2668_s14 = scalar_select %p2251_p3, 1, 0 }
  0x1b   : > { %p1641_p4 = pneg %p2251_p3  ;;  %s257_s18 = sshll.u32 %s2128_s17, 4  ;;  %s2263_s18 = int_to_ptr.vmem [resolvable:$true] %s257_s18 }
  0x1c   : > { %2669 = sst [smem:[#allocation23_spill]] %s2668_s14  ;;  %s2265_s21 = sshll.u32 %s2129_s20, 4  ;;  %s282_s21 = int_to_ptr.vmem [resolvable:$true] %s2265_s21 }
  0x1d   : > { %p2259_p5 = pnand %p1641_p4, %p2246_p1  ;;  %s2671_s1 = sld [smem:[#allocation25_spill]] }
  0x1f   : > { %p2275_p7 = pneg %p2259_p5 }
  0x23   : > { %s1793_s15 = scalar_lea.hbm %s2671_s1, 32 }
  0x24   : > { %p1794_p6 = scmp.ne.s32.totalorder %s2671_s1, %s1793_s15  ;;  %p1800_p10 = scmp.lt.u32.totalorder %s1793_s15, %s2671_s1 }
  0x26   : > { %p1796_p8 = pnand %p2275_p7, %p1794_p6 }
  0x28   : > { %p1797_p9 = pneg %p1796_p8 }
  0x2a   : > { %p1802_p11 = pnand %p1800_p10, %p1797_p9 }
  0x2c   : > { %1805 = shalt.err (!%p1802_p11)
}
  0x2d   : > { %s1806_s22 = scalar_lea.vmem %s237_s16, 32  ;;  %p1814_p2 = scmp.lt.s32.totalorder %s237_s16, %s237_s16 }
  0x2e   : > { %p1807_p12 = scmp.ne.s32.totalorder %s237_s16, %s1806_s22  ;;  %p1815_p4 = scmp.lt.s32.totalorder %s1806_s22, %s1806_s22 }
  0x30   : > { %p1809_p13 = pnand %p1807_p12, %p2275_p7  ;;  %p1816_p3 = por %p1815_p4, %p1814_p2 }
  0x32   : > { %p1810_p0 = pneg %p1809_p13 }
  0x34   : > { %p1817_p1 = pnand %p1816_p3, %p1810_p0 }
  0x36   : > { %1820 = shalt.err (!%p1817_p1)
}
  0x37   : > { %1644 = dma.hbm_to_vmem [thread:$0]  (!%p2259_p5), %s2671_s1, 32, %s237_s16, [#allocation6]  }
  0x38   : > { %s2673_s3 = sld [smem:[#allocation27_spill]] }
  0x3e   : > { %s1821_s15 = scalar_lea.hbm %s2673_s3, 512 }
  0x3f   : > { %p1822_p6 = scmp.ne.s32.totalorder %s2673_s3, %s1821_s15  ;;  %p1828_p1 = scmp.lt.u32.totalorder %s1821_s15, %s2673_s3 }
  0x41   : > { %p1824_p8 = pnand %p1822_p6, %p2275_p7 }
  0x43   : > { %p1825_p9 = pneg %p1824_p8 }
  0x45   : > { %p1830_p3 = pnand %p1828_p1, %p1825_p9 }
  0x47   : > { %1833 = shalt.err (!%p1830_p3)
}
  0x48   : > { %s1834_s16 = scalar_lea.vmem %s2263_s18, 512  ;;  %p1842_p13 = scmp.lt.s32.totalorder %s2263_s18, %s2263_s18 }
  0x49   : > { %p1835_p10 = scmp.ne.s32.totalorder %s2263_s18, %s1834_s16  ;;  %p1843_p0 = scmp.lt.s32.totalorder %s1834_s16, %s1834_s16 }
  0x4b   : > { %p1837_p11 = pnand %p1835_p10, %p2275_p7  ;;  %p1844_p2 = por %p1843_p0, %p1842_p13 }
  0x4d   : > { %p1838_p12 = pneg %p1837_p11 }
  0x4f   : > { %p1845_p4 = pnand %p1844_p2, %p1838_p12 }
  0x51   : > { %1848 = shalt.err (!%p1845_p4)
}
  0x52   : > { %s2130_s30 = smov 64   ;;  %s2131_s14 = smov 4  }
  0x53   : > { %1650 = dma.hbm_to_vmem [thread:$0]  (!%p2259_p5), %s2673_s3, 512, %s2263_s18, [#allocation9], %s2130_s30, %s2130_s30, %s2131_s14  }
  0x54   : > { %s1849_s15 = scalar_lea.hbm %s2647_s5, 8192 }
  0x55   : > { %p1850_p6 = scmp.ne.s32.totalorder %s2647_s5, %s1849_s15  ;;  %p1856_p1 = scmp.lt.u32.totalorder %s1849_s15, %s2647_s5 }
  0x57   : > { %p1852_p8 = pnand %p1850_p6, %p2275_p7 }
  0x59   : > { %p1853_p9 = pneg %p1852_p8 }
  0x5b   : > { %p1858_p3 = pnand %p1856_p1, %p1853_p9 }
  0x5d   : > { %1861 = shalt.err (!%p1858_p3)
}
  0x5e   : > { %s1862_s7 = scalar_lea.vmem %s282_s21, 8192  ;;  %p1870_p13 = scmp.lt.s32.totalorder %s282_s21, %s282_s21 }
  0x5f   : > { %p1863_p10 = scmp.ne.s32.totalorder %s282_s21, %s1862_s7  ;;  %p1871_p0 = scmp.lt.s32.totalorder %s1862_s7, %s1862_s7 }
  0x61   : > { %p1865_p11 = pnand %p1863_p10, %p2275_p7  ;;  %p1872_p2 = por %p1871_p0, %p1870_p13 }
  0x63   : > { %p1866_p12 = pneg %p1865_p11 }
  0x65   : > { %p1873_p4 = pnand %p1872_p2, %p1866_p12 }
  0x67   : > { %1876 = shalt.err (!%p1873_p4)
}
  0x68   : > { %s2132_s18 = smov 512   ;;  %s2133_s30 = smov 32  }
  0x69   : > { %1656 = dma.hbm_to_vmem [thread:$0]  (!%p2259_p5), %s2647_s5, 8192, %s282_s21, [#allocation12], %s2132_s18, %s2132_s18, %s2133_s30  }
  0x6a   : > { %s2134_s12 = smov [#allocation7]   ;;  %s2135_s23 = smov [#allocation10]  }
  0x6b   : > { %s247_s8 = sshll.u32 %s2134_s12, 4  ;;  %s271_s15 = sshll.u32 %s2135_s23, 4  ;;  %s248_s8 = int_to_ptr.vmem [resolvable:$true] %s247_s8  ;;  %s272_s15 = int_to_ptr.vmem [resolvable:$true] %s271_s15 }
  0x6c   : > { %s2674_s2 = sld [smem:[#allocation26_spill]] }
  0x72   : > { %s1877_s16 = scalar_lea.hbm %s2674_s2, 16 }
  0x73   : > { %p1878_p6 = scmp.ne.s32.totalorder %s2674_s2, %s1877_s16  ;;  %p1884_p1 = scmp.lt.u32.totalorder %s1877_s16, %s2674_s2 }
  0x75   : > { %p1880_p8 = pnand %p1878_p6, %p2275_p7 }
  0x77   : > { %p1881_p9 = pneg %p1880_p8 }
  0x79   : > { %p1886_p3 = pnand %p1884_p1, %p1881_p9 }
  0x7b   : > { %1889 = shalt.err (!%p1886_p3)
}
  0x7c   : > { %s1890_s21 = scalar_lea.vmem %s248_s8, 16  ;;  %s1897_s18 = scalar_lea.vmem %s248_s8, 32 }
  0x7d   : > { %p1891_p10 = scmp.ne.s32.totalorder %s248_s8, %s1890_s21  ;;  %p1898_p13 = scmp.lt.s32.totalorder %s248_s8, %s248_s8 }
  0x7e   : > { %p1899_p0 = scmp.lt.s32.totalorder %s1897_s18, %s1890_s21 }
  0x7f   : > { %p1893_p11 = pnand %p1891_p10, %p2275_p7 }
  0x80   : > { %p1900_p2 = por %p1899_p0, %p1898_p13 }
  0x81   : > { %p1894_p12 = pneg %p1893_p11 }
  0x83   : > { %p1901_p4 = pnand %p1900_p2, %p1894_p12 }
  0x85   : > { %1904 = shalt.err (!%p1901_p4)
}
  0x86   : > { %1647 = dma.hbm_to_vmem [thread:$0]  (!%p2259_p5), %s2674_s2, 16, %s248_s8, [#allocation6]  }
  0x87   : > { %s2675_s4 = sld [smem:[#allocation28_spill]] }
  0x8d   : > { %s1905_s1 = scalar_lea.hbm %s2675_s4, 16 }
  0x8e   : > { %p1906_p6 = scmp.ne.s32.totalorder %s2675_s4, %s1905_s1  ;;  %p1912_p1 = scmp.lt.u32.totalorder %s1905_s1, %s2675_s4 }
  0x90   : > { %p1908_p8 = pnand %p1906_p6, %p2275_p7 }
  0x92   : > { %p1909_p9 = pneg %p1908_p8 }
  0x94   : > { %p1914_p3 = pnand %p1912_p1, %p1909_p9 }
  0x96   : > { %1917 = shalt.err (!%p1914_p3)
}
  0x97   : > { %s1918_s22 = scalar_lea.vmem %s272_s15, 16  ;;  %s1925_s8 = scalar_lea.vmem %s272_s15, 32 }
  0x98   : > { %p1919_p10 = scmp.ne.s32.totalorder %s272_s15, %s1918_s22  ;;  %p1926_p13 = scmp.lt.s32.totalorder %s272_s15, %s272_s15 }
  0x99   : > { %p1927_p0 = scmp.lt.s32.totalorder %s1925_s8, %s1918_s22 }
  0x9a   : > { %p1921_p11 = pnand %p1919_p10, %p2275_p7 }
  0x9b   : > { %p1928_p2 = por %p1927_p0, %p1926_p13 }
  0x9c   : > { %p1922_p12 = pneg %p1921_p11 }
  0x9e   : > { %p1929_p4 = pnand %p1928_p2, %p1922_p12 }
  0xa0   : > { %1932 = shalt.err (!%p1929_p4)
}
  0xa1   : > { %1653 = dma.hbm_to_vmem [thread:$0]  (!%p2259_p5), %s2675_s4, 16, %s272_s15, [#allocation9]  }
  0xa2   : > { %s2136_s21 = smov [#allocation13]   ;;  %s1933_s0 = scalar_lea.hbm %s2648_s6, 128 }
  0xa3   : > { %s295_s18 = sshll.u32 %s2136_s21, 4  ;;  %p1934_p6 = scmp.ne.s32.totalorder %s2648_s6, %s1933_s0  ;;  %s296_s18 = int_to_ptr.vmem [resolvable:$true] %s295_s18 }
  0xa4   : > { %p1940_p1 = scmp.lt.u32.totalorder %s1933_s0, %s2648_s6 }
  0xa5   : > { %p1936_p8 = pnand %p1934_p6, %p2275_p7 }
  0xa7   : > { %p1937_p9 = pneg %p1936_p8 }
  0xa9   : > { %p1942_p3 = pnand %p1940_p1, %p1937_p9 }
  0xab   : > { %1945 = shalt.err (!%p1942_p3)
}
  0xac   : > { %s1946_s15 = scalar_lea.vmem %s296_s18, 128  ;;  %p1954_p13 = scmp.lt.s32.totalorder %s296_s18, %s296_s18 }
  0xad   : > { %p1947_p10 = scmp.ne.s32.totalorder %s296_s18, %s1946_s15  ;;  %p1955_p0 = scmp.lt.s32.totalorder %s1946_s15, %s1946_s15 }
  0xaf   : > { %p1949_p11 = pnand %p1947_p10, %p2275_p7  ;;  %p1956_p2 = por %p1955_p0, %p1954_p13 }
  0xb1   : > { %p1950_p12 = pneg %p1949_p11 }
  0xb3   : > { %p1957_p4 = pnand %p1956_p2, %p1950_p12 }
  0xb5   : > { %1960 = shalt.err (!%p1957_p4)
}
  0xb6   : > { %1659 = dma.hbm_to_vmem [thread:$0]  (!%p2259_p5), %s2648_s6, 128, %s296_s18, [#allocation12]  }
  0xb7   : > { %s1481_s17 = sadd.s32 4294967294, %s2125_s11   ;;  %s35_s19 = sadd.s32 1, %s2117_s9 }
  0xb8   : > { %p36_p7 = scmp.ge.s32.totalorder %s35_s19, 3  ;;  %s38_s22 = sadd.s32 1, %s2121_s10 }
  0xb9   : > { %s47_s8 = sadd.s32 1, %s2105_s29  ;;  %p54_p6 = scmp.ne.s32.totalorder %s2105_s29, %s2101_s28 }
  0xba   : > { %s2705_s19 = smov (%p36_p7, %s35_s19), 0  ;;  %s2707_s22 = smov (!%p36_p7, %s38_s22), %s2121_s10 }
  0xbb   : > { %s43_s16 = ssub.s32 %s2117_s9, %s2705_s19  ;;  %p55_p8 = scmp.eq.s32.totalorder %s2125_s11, 0 }
  0xbc   : > { %s2676_s7 = sld [smem:[#allocation20_spill]]  ;;  %p40_p5 = scmp.ge.s32.totalorder %s2707_s22, 2 }
  0xbd   : > { %p60_p9 = scmp.ne.s32.totalorder %s2101_s28, %s2097_s27  ;;  %p2401_p1 = por %p55_p8, %p54_p6 }
  0xbe   : > { %s199_s18 = sadd.s32 1, %s2093_s26  ;;  %s2709_s22 = smov (%p40_p5, %s2707_s22), 0 }
  0xbf   : > { %p2678_p3 = scmp.ne.s32.totalorder %s2667_s13, 0  ;;  %p209_p11 = scmp.ne.s32.totalorder %s2093_s26, %s2089_s25 }
  0xc0   : > { %s42_s30 = ssub.s32 %s2121_s10, %s2709_s22  ;;  %s2680_s27 = sadd.s32 4294967295, %s2125_s11  }
  0xc1   : > { %p2410_p10 = por %p2678_p3, %p60_p9  ;;  %p210_p12 = scmp.eq.s32.totalorder %s2680_s27, 5 }
  0xc2   : > { %s44_s0 = sor.u32 %s43_s16, %s42_s30  ;;  %p197_p13 = scmp.eq.s32.totalorder %s42_s30, 0 }
  0xc3   : > { %p45_p0 = scmp.eq.s32.totalorder %s44_s0, 0  ;;  %p2420_p2 = por %p210_p12, %p209_p11 }
  0xc4   : > { %s2425_s1 = scalar_select %p197_p13, %s2093_s26, %s199_s18  }
  0xc5   : > { %s2681_s24 = scalar_select %p2420_p2, 1, 0 }
  0xc6   : > { %s2428_s14 = scalar_select %p45_p0, %s2105_s29, %s47_s8  }
  0xc7   : > { %p215_p4 = scmp.ne.s32.totalorder %s2089_s25, %s2676_s7  ;;  %p216_p7 = scmp.eq.s32.totalorder %s1481_s17, 5 }
  0xc8   : > { %p1674_p6 = scmp.lt.s32.totalorder %s2125_s11, 6  ;;  %s306_s12 = sand.u32 1, %s2105_s29  }
  0xc9   : > { %p2434_p8 = por %p216_p7, %p215_p4  ;;  %s1490_s23 = sshll.u32 %s306_s12, 4 }
  0xca   : > { %s1491_s20 = sshll.u32 %s2117_s9, 1  ;;  %s1612_s16 = smul.u32 6, %s2121_s10 }
  0xcb   : > { %s2682_s15 = scalar_select %p2434_p8, 1, 0 }
  0xcc   : > { %s310_s30 = scalar_lea.vmem [#allocation2], %s1490_s23  ;;  %p2442_p5 = pnand %p1674_p6, %p2401_p1 }
  0xcd   : > { %s319_s27 = sshll.u32 %s310_s30, 4  ;;  %s316_s8 = sadd.s32 %s1612_s16, %s1491_s20  ;;  %s2446_s27 = int_to_ptr.vmem [resolvable:$true] %s319_s27 }
  0xce   : > { %s1492_s17 = sshll.u32 %s316_s8, 7  ;;  %s2684_s2 = sld [smem:[#allocation24_spill]] }
  0xcf   : > { %s2453_s21 = scalar_lea.sflag [#allocation3], %s306_s12  ;;  %p1963_p1 = pneg %p2442_p5 }
  0xd4   : > { %s2451_s4 = scalar_lea.hbm %s2684_s2, %s1492_s17  ;;  %s1966_s30 = scalar_lea.hbm %s2684_s2, 1536 }
  0xd5   : > { %s1961_s23 = scalar_lea.hbm %s2451_s4, 256  ;;  %p1967_p12 = scmp.lt.u32.totalorder %s2451_s4, %s2684_s2 }
  0xd6   : > { %p1962_p9 = scmp.ne.s32.totalorder %s2451_s4, %s1961_s23  ;;  %p1968_p13 = scmp.lt.u32.totalorder %s1966_s30, %s1961_s23 }
  0xd7   : > { %p1970_p4 = scmp.lt.u32.totalorder %s1961_s23, %s2451_s4 }
  0xd8   : > { %p1964_p3 = pnand %p1963_p1, %p1962_p9  ;;  %p1969_p0 = por %p1968_p13, %p1967_p12 }
  0xda   : > { %p1965_p11 = pneg %p1964_p3  ;;  %p1971_p7 = por %p1970_p4, %p1969_p0 }
  0xdc   : > { %p1972_p6 = pnand %p1971_p7, %p1965_p11 }
  0xde   : > { %1975 = shalt.err (!%p1972_p6)
}
  0xdf   : > { %s1976_s12 = scalar_lea.vmem %s2446_s27, 256  ;;  %s2137_s7 = smov [#allocation2]  }
  0xe0   : > { %p1977_p9 = scmp.ne.s32.totalorder %s2446_s27, %s1976_s12  ;;  %s1981_s18 = sshll.u32 %s2137_s7, 4  ;;  %s1982_s18 = int_to_ptr.vmem [resolvable:$false] %s1981_s18 }
  0xe1   : > { %s1983_s20 = scalar_lea.vmem %s1982_s18, 512  ;;  %p1984_p2 = scmp.lt.s32.totalorder %s2446_s27, %s1982_s18 }
  0xe2   : > { %p1979_p3 = pnand %p1977_p9, %p1963_p1  ;;  %p1985_p12 = scmp.lt.s32.totalorder %s1983_s20, %s1976_s12 }
  0xe4   : > { %p1980_p8 = pneg %p1979_p3  ;;  %p1986_p13 = por %p1985_p12, %p1984_p2 }
  0xe6   : > { %p1987_p0 = pnand %p1986_p13, %p1980_p8 }
  0xe8   : > { %1990 = shalt.err (!%p1987_p0)
}
  0xe9   : > { %s2138_s23 = smov 128   ;;  %s2139_s16 = smov 8  }
  0xea   : > { %1663 = dma.hbm_to_vmem [thread:$0]  (!%p2442_p5), %s2451_s4, 256, %s2446_s27, %s2453_s21, %s2138_s23, %s2138_s23, %s2139_s16  }
  0xeb   : > { %s2685_s30 = sld [smem:[#allocation23_spill]] }
  0xf1   : > { %p2686_p1 = scmp.ne.s32.totalorder %s2685_s30, 0 }
  0xf2   : > { %s333_s8 = sand.u32 (!%p2686_p1), 1, %s2101_s28  }
  0xf3   : > { %331 = sbr.rel (%p2686_p1) target bundleno = 997 (0x3e5), region = 48  ;;  %s2484_s17 = sshll.u32 (!%p2686_p1), %s333_s8, 4 }
  0xf4   : > { %s334_s12 = scalar_lea.sflag (!%p2686_p1), [#allocation3], %s333_s8  ;;  %s337_s7 = scalar_lea.vmem (!%p2686_p1), [#allocation2], %s2484_s17 }
  0xfa   : > { %2064 = dma.done.wait (%p2410_p10), %s334_s12, 256  }
  0xfb   : > { %2066 = vsyncadd (%p2410_p10), %s334_s12, 4294967040  ;;  %p2687_p2 = scmp.ne.s32.totalorder %s2667_s13, 0 }
  0xfd   : > { %2068 = dma.done.wait (%p2687_p2), [#allocation6], 48  }
  0xfe   : > { %2070 = vsyncadd (%p2687_p2), [#allocation6], 4294967248 }
  0xff   : > { %2072 = dma.done.wait (%p2687_p2), [#allocation9], 528  }
 0x100   : > { %2074 = vsyncadd (%p2687_p2), [#allocation9], 4294966768 }
 0x101   : > { %2076 = dma.done.wait (%p2687_p2), [#allocation12], 8320  }
 0x102   : > { %2078 = vsyncadd (%p2687_p2), [#allocation12], 4294958976  ;;  %s389_s4 = sand.u32 1, %s2089_s25   ;;  %s2688_s0 = sld [smem:[#allocation21_spill]] }
 0x103   : > { %s1501_s3 = sshll.u32 %s389_s4, 6 }
 0x104   : > { %s2506_s27 = scalar_lea.vmem [#allocation14], %s1501_s3 }
 0x108   : > { %p1502_p10 = scmp.ne.s32.totalorder %s2688_s0, 0 }
 0x109   : > { %v2140_v0 = vmov (!%p1502_p10), -inf  }
 0x10a   : > { %397 = sbr.rel (%p1502_p10) target bundleno = 273 (0x111), region = 80  ;;  %398 = vst [vmem:[%s2506_s27] sm:$0xff] (!%p1502_p10), %v2140_v0  ;;  %399 = vst [vmem:[%s2506_s27 + $0x8] sm:$0xff] (!%p1502_p10), %v2140_v0 }
 0x10b   : > { %400 = vst [vmem:[%s2506_s27 + $0x10] sm:$0xff] (!%p1502_p10), %v2140_v0  ;;  %401 = vst [vmem:[%s2506_s27 + $0x18] sm:$0xff] (!%p1502_p10), %v2140_v0 }
 0x10c   : > { %402 = vst [vmem:[%s2506_s27 + $0x20] sm:$0xff] (!%p1502_p10), %v2140_v0  ;;  %403 = vst [vmem:[%s2506_s27 + $0x28] sm:$0xff] (!%p1502_p10), %v2140_v0 }
 0x10d   : > { %404 = vst [vmem:[%s2506_s27 + $0x30] sm:$0xff] (!%p1502_p10), %v2140_v0  ;;  %405 = vst [vmem:[%s2506_s27 + $0x38] sm:$0xff] (!%p1502_p10), %v2140_v0 }
 0x111 PF: > { %v409_v1 = vld [vmem:[#allocation5] sm:$0x3]  ;;  %vm414_vm0 = vcmask 1040384   ;;  %vm415_vm1 = vcmask 1041408   ;;  %v2141_v2 = vmov 0.0   ;;  %v2142_v3 = vmov 65535  }
 0x112   : > { %1594 = vmatprep.subr.bf16.mxu0 %v2141_v2  ;;  %v416_v4 = vsel %vm414_vm0, 4294967295, %v2142_v3  ;;  %v406_v5 = vld [vmem:[%s337_s7] sm:$0xff]  ;;  %v407_v6 = vld [vmem:[%s337_s7 + $0x8] sm:$0xff]  ;;  %1600 = vmatprep.subr.bf16.mxu1 %v2141_v2  ;;  %vm2143_vm2 = vmmov 0   ;;  %vm410_vm3 = vcmask 23552   ;;  %v2144_v14 = vmov 0  }
 0x113   : > { %v1788_v7 = vld [vmem:[#allocation8] sm:$0xff]   ;;  %v417_v8 = vsel %vm415_vm1, %v416_v4, 0  ;;  %1596 = vmatprep.mubr.msk.bf16.mxu0 %vm2143_vm2, %v2141_v2  ;;  %v1789_v9 = vld [vmem:[#allocation8 + $0x8] sm:$0xff]   ;;  %1608 = vmatprep.mubr.msk.bf16.mxu1 %vm2143_vm2, %v2141_v2  ;;  %v408_v11 = vpack.c.bf16 %v407_v6, %v406_v5  ;;  %v1790_v12 = vld [vmem:[#allocation8 + $0x10] sm:$0xff]   ;;  %v467_v43 = vlaneseq  ;;  %vm505_vm4 = vcmask 523264   ;;  %s2689_s13 = sld [smem:[#allocation22_spill]] }
 0x114   : > { %v419_v10 = vand.u32 %v417_v8, %v409_v1  ;;  %1601 = vmatpush3.bf16.msra.mxu1 %v1788_v7  ;;  %v1791_v13 = vld [vmem:[#allocation8 + $0x18] sm:$0xff]   ;;  %v561_v15 = vld [vmem:[#allocation11] sm:$0xff]  ;;  %v562_v17 = vld [vmem:[#allocation11 + $0x8] sm:$0xff]  ;;  %s1339_s18 = sshll.u32 %s2506_s27, 4  ;;  %s2690_s16 = sld [smem:[#allocation29_spill]]  ;;  %s2576_s18 = int_to_ptr.vmem [resolvable:$true] %s1339_s18 }
 0x115   : > { %1602 = vmatprep.subr.bf16.mxu1 %v2141_v2  ;;  %v565_v16 = vld [vmem:[#allocation11 + $0x20] sm:$0xff]  ;;  %v566_v20 = vld [vmem:[#allocation11 + $0x28] sm:$0xff]  ;;  %v2522_v44 = vshrl.u32 %v467_v43, 7  ;;  %v463_v45 = vld [vmem:[#allocation7] sm:$0x1]  ;;  %s1325_s8 = scalar_lea.sflag [#allocation4], %s389_s4 }
 0x116   : > { %1595 = vmatpush3.bf16.msra.mxu0 %v419_v10  ;;  %v1509_v18 = vcombine.low %v561_v15, %v565_v16  ;;  %v1510_v19 = vcombine.high %v561_v15, %v565_v16  ;;  %v569_v21 = vld [vmem:[#allocation11 + $0x40] sm:$0xff]  ;;  %v1511_v23 = vcombine.low %v562_v17, %v566_v20  ;;  %v1512_v24 = vcombine.high %v562_v17, %v566_v20  ;;  %v570_v54 = vld [vmem:[#allocation11 + $0x48] sm:$0xff]  ;;  %s1991_s17 = scalar_lea.vmem %s2576_s18, 1024  ;;  %p2691_p5 = scmp.ne.s32.totalorder %s2681_s24, 0 }
 0x117   : > { %v573_v22 = vld [vmem:[#allocation11 + $0x60] sm:$0xff]  ;;  %v465_v46 = vpack.i.b16 %v463_v45, %v463_v45  ;;  %v2525_v47 = vsub.s32 0, %v2522_v44  ;;  %v574_v55 = vld [vmem:[#allocation11 + $0x68] sm:$0xff]  ;;  %p1992_p8 = scmp.ne.s32.totalorder %s2576_s18, %s1991_s17  ;;  %s2146_s12 = smov [#allocation14]  }
 0x118   : > { %1603 = vmatpush3.bf16.msra.mxu1 %v1789_v9  ;;  %v1518_v25 = vcombine.high %v569_v21, %v573_v22  ;;  %945 = vmatprep.subr.bf16.mxu0 %v1510_v19  ;;  %v1517_v26 = vcombine.low %v569_v21, %v573_v22  ;;  %v577_v27 = vld [vmem:[#allocation11 + $0x80] sm:$0xff]  ;;  %v1520_v58 = vcombine.high %v570_v54, %v574_v55  ;;  %v578_v59 = vld [vmem:[#allocation11 + $0x88] sm:$0xff]  ;;  %s1995_s7 = sshll.u32 %s2146_s12, 4  ;;  %s1996_s7 = int_to_ptr.vmem [resolvable:$false] %s1995_s7 }
 0x119   : > { %1597 = vmatmul.mubr.msk.bf16.vlgmr.msra.gmra.mrb[0].mxu0 %vm410_vm3, %v408_v11  ;;  %1604 = vmatprep.subr.bf16.mxu1 %v2141_v2  ;;  %v581_v28 = vld [vmem:[#allocation11 + $0xa0] sm:$0xff]  ;;  %v470_v50 = vrot.slane %v465_v46, %v2525_v47  ;;  %v582_v60 = vld [vmem:[#allocation11 + $0xa8] sm:$0xff]  ;;  %v1519_v61 = vcombine.low %v570_v54, %v574_v55  ;;  %v571_v46 = vld [vmem:[#allocation11 + $0x50] sm:$0xff]  ;;  %s1586_s21 = sshll.u32 %s2689_s13, 10  ;;  %p1993_p11 = pnand %p1992_p8, %p2691_p5 }
 0x11a   : > { %977 = vmatprep.mubr.bf16.mxu0 %v2144_v14  ;;  %946 = vmatpush1.bf16.msra.mxu0 %v1509_v18  ;;  %v1526_v29 = vcombine.high %v577_v27, %v581_v28  ;;  %v1525_v30 = vcombine.low %v577_v27, %v581_v28  ;;  %v585_v31 = vld [vmem:[#allocation11 + $0xc0] sm:$0xff]  ;;  %v1528_v62 = vcombine.high %v578_v59, %v582_v60  ;;  %v586_v63 = vld [vmem:[#allocation11 + $0xc8] sm:$0xff]  ;;  %v579_v55 = vld [vmem:[#allocation11 + $0x90] sm:$0xff]  ;;  %s2574_s30 = scalar_lea.hbm %s2690_s16, %s1586_s21  ;;  %s1997_s3 = scalar_lea.vmem %s1996_s7, 2048 }
 0x11b   : > { %947 = vmatprep.subr.bf16.mxu0 %v1518_v25  ;;  %v589_v32 = vld [vmem:[#allocation11 + $0xe0] sm:$0xff]  ;;  %v590_v0 = vld [vmem:[#allocation11 + $0xe8] sm:$0xff]  ;;  %v1527_v1 = vcombine.low %v578_v59, %v582_v60  ;;  %p1994_p4 = pneg %p1993_p11  ;;  %p1998_p7 = scmp.lt.s32.totalorder %s2576_s18, %s1996_s7 }
 0x11c   : > { %1605 = vmatpush3.bf16.msra.mxu1 %v1790_v12  ;;  %v1534_v33 = vcombine.high %v585_v31, %v589_v32  ;;  %v1533_v34 = vcombine.low %v585_v31, %v589_v32  ;;  %v593_v35 = vld [vmem:[#allocation11 + $0x100] sm:$0xff]  ;;  %v594_v3 = vld [vmem:[#allocation11 + $0x108] sm:$0xff]  ;;  %v1535_v5 = vcombine.low %v586_v63, %v590_v0  ;;  %v564_v31 = vld [vmem:[#allocation11 + $0x18] sm:$0xff]  ;;  %p1999_p6 = scmp.lt.s32.totalorder %s1997_s3, %s1991_s17 }
 0x11d   : > { %1606 = vmatprep.subr.bf16.mxu1 %v2141_v2  ;;  %v597_v36 = vld [vmem:[#allocation11 + $0x120] sm:$0xff]  ;;  %v1536_v2 = vcombine.high %v586_v63, %v590_v0  ;;  %v598_v4 = vld [vmem:[#allocation11 + $0x128] sm:$0xff]  ;;  %v587_v63 = vld [vmem:[#allocation11 + $0xd0] sm:$0xff] }
 0x11e   : > { %948 = vmatpush1.bf16.msra.mxu0 %v1517_v26  ;;  %v1542_v37 = vcombine.high %v593_v35, %v597_v36  ;;  %v1541_v38 = vcombine.low %v593_v35, %v597_v36  ;;  %v601_v39 = vld [vmem:[#allocation11 + $0x140] sm:$0xff]  ;;  %v1544_v6 = vcombine.high %v594_v3, %v598_v4  ;;  %v602_v7 = vld [vmem:[#allocation11 + $0x148] sm:$0xff]  ;;  %v1543_v9 = vcombine.low %v594_v3, %v598_v4  ;;  %v591_v0 = vld [vmem:[#allocation11 + $0xf0] sm:$0xff]  ;;  %p2000_p9 = por %p1999_p6, %p1998_p7 }
 0x11f   : > { %949 = vmatprep.subr.bf16.mxu0 %v1526_v29  ;;  %v605_v40 = vld [vmem:[#allocation11 + $0x160] sm:$0xff]  ;;  %v606_v8 = vld [vmem:[#allocation11 + $0x168] sm:$0xff]  ;;  %v563_v29 = vld [vmem:[#allocation11 + $0x10] sm:$0xff] }
 0x120   : > { %1607 = vmatpush3.bf16.msra.mxu1 %v1791_v13  ;;  %v1550_v41 = vcombine.high %v601_v39, %v605_v40  ;;  %v1549_v42 = vcombine.low %v601_v39, %v605_v40  ;;  %v1552_v10 = vcombine.high %v602_v7, %v606_v8  ;;  %v1551_v11 = vcombine.low %v602_v7, %v606_v8  ;;  %v609_v12 = vld [vmem:[#allocation11 + $0x180] sm:$0xff]  ;;  %v610_v15 = vld [vmem:[#allocation11 + $0x188] sm:$0xff]  ;;  %v595_v7 = vld [vmem:[#allocation11 + $0x110] sm:$0xff]  ;;  %p2001_p3 = pnand %p2000_p9, %p1994_p4 }
 0x121   : > { %988 = vmatprep.subr.bf16.mxu1 %v1512_v24  ;;  %v613_v13 = vld [vmem:[#allocation11 + $0x1a0] sm:$0xff]  ;;  %v614_v17 = vld [vmem:[#allocation11 + $0x1a8] sm:$0xff]  ;;  %v599_v8 = vld [vmem:[#allocation11 + $0x130] sm:$0xff] }
 0x122   : > { %950 = vmatpush1.bf16.msra.mxu0 %v1525_v30  ;;  %v1558_v16 = vcombine.high %v609_v12, %v613_v13  ;;  %v1557_v18 = vcombine.low %v609_v12, %v613_v13  ;;  %v1559_v19 = vcombine.low %v610_v15, %v614_v17  ;;  %v1560_v20 = vcombine.high %v610_v15, %v614_v17  ;;  %v617_v21 = vld [vmem:[#allocation11 + $0x1c0] sm:$0xff]  ;;  %v622_v25 = vld [vmem:[#allocation11 + $0x1e8] sm:$0xff]  ;;  %v567_v30 = vld [vmem:[#allocation11 + $0x30] sm:$0xff] }
 0x123   : > { %951 = vmatprep.subr.bf16.mxu0 %v1534_v33  ;;  %v621_v22 = vld [vmem:[#allocation11 + $0x1e0] sm:$0xff]  ;;  %v1514_v32 = vcombine.high %v563_v29, %v567_v30  ;;  %v568_v33 = vld [vmem:[#allocation11 + $0x38] sm:$0xff]  ;;  %v1546_v13 = vcombine.high %v595_v7, %v599_v8  ;;  %v607_v17 = vld [vmem:[#allocation11 + $0x170] sm:$0xff] }
 0x124   : > { %v1566_v24 = vcombine.high %v617_v21, %v621_v22  ;;  %v1565_v26 = vcombine.low %v617_v21, %v621_v22  ;;  %v1515_v35 = vcombine.low %v564_v31, %v568_v33  ;;  %v1516_v36 = vcombine.high %v564_v31, %v568_v33  ;;  %v623_v33 = vld [vmem:[#allocation11 + $0x1f0] sm:$0xff] }
 0x126   : > { %952 = vmatpush1.bf16.msra.mxu0 %v1533_v34  ;;  %v1513_v34 = vcombine.low %v563_v29, %v567_v30 }
 0x127   : > { %953 = vmatprep.subr.bf16.mxu0 %v1542_v37  ;;  %v551_v37 = vld [vmem:[#allocation10] sm:$0x1] }
 0x12a   : > { %954 = vmatpush1.bf16.msra.mxu0 %v1541_v38  ;;  %v553_v38 = vpack.i.b16 %v551_v37, %v551_v37 }
 0x12b   : > { %955 = vmatprep.subr.bf16.mxu0 %v1550_v41 }
 0x12c   : > { %v558_v41 = vrot.slane %v553_v38, %v2525_v47 }
 0x12e   : > { %956 = vmatpush1.bf16.msra.mxu0 %v1549_v42 }
 0x12f   : > { %957 = vmatprep.subr.bf16.mxu0 %v1558_v16  ;;  %v603_v16 = vld [vmem:[#allocation11 + $0x150] sm:$0xff] }
 0x130   : > { %v1554_v22 = vcombine.high %v603_v16, %v607_v17 }
 0x132   : > { %958 = vmatpush1.bf16.msra.mxu0 %v1557_v18  ;;  %v604_v18 = vld [vmem:[#allocation11 + $0x158] sm:$0xff] }
 0x133   : > { %959 = vmatprep.subr.bf16.mxu0 %v1566_v24  ;;  %v611_v24 = vld [vmem:[#allocation11 + $0x190] sm:$0xff] }
 0x136   : > { %960 = vmatpush1.bf16.msra.mxu0 %v1565_v26  ;;  %v612_v26 = vld [vmem:[#allocation11 + $0x198] sm:$0xff] }
 0x137   : > { %1031 = vmatprep.subr.bf16.mxu0 %v1514_v32  ;;  %v619_v32 = vld [vmem:[#allocation11 + $0x1d0] sm:$0xff] }
 0x138   : > { %v1570_v38 = vcombine.high %v619_v32, %v623_v33 }
 0x1ec   : > { %v455_v48 = vpop.f32.mrb[0].mxu0 }
 0x1ed   : > { %v1598_v49 = vpop.f32.mrb[1].mxu0 }
 0x1ee   : > { %v458_v51 = vpop.f32.mrb[2].mxu0  ;;  %v572_v49 = vld [vmem:[#allocation11 + $0x58] sm:$0xff] }
 0x1ef   : > { %v462_v52 = vpack.c.bf16 %v458_v51, %v455_v48  ;;  %v1599_v53 = vpop.f32.mrb[3].mxu0  ;;  %v575_v48 = vld [vmem:[#allocation11 + $0x70] sm:$0xff] }
 0x1f0   : > { %v1522_v53 = vcombine.high %v571_v46, %v575_v48  ;;  %v1521_v59 = vcombine.low %v571_v46, %v575_v48  ;;  %v1125_v48 = vld [vmem:[#allocation13] sm:$0xff] }
 0x1f1   : > { %v471_v56 = vadd.bf16 %v470_v50, %v462_v52  ;;  %v576_v50 = vld [vmem:[#allocation11 + $0x78] sm:$0xff] }
 0x1f2   : > { %v1524_v54 = vcombine.high %v572_v49, %v576_v50  ;;  %v1523_v60 = vcombine.low %v572_v49, %v576_v50 }
 0x1f3   : > { %v472_v57 = vmax.bf16 %v2144_v14, %v471_v56  ;;  %v583_v56 = vld [vmem:[#allocation11 + $0xb0] sm:$0xff] }
 0x1f4   : > { %v1529_v3 = vcombine.low %v579_v55, %v583_v56 }
 0x1f5   : > { %1609 = vmatmul.mubr.msk.bf16.vlgmr.msra.gmra.mrb[0].mxu1 %vm505_vm4, %v472_v57  ;;  %v580_v57 = vld [vmem:[#allocation11 + $0x98] sm:$0xff] }
 0x1f6   : > { %989 = vmatpush1.bf16.msra.mxu1 %v1511_v23  ;;  %1020 = vmatprep.mubr.bf16.mxu1 %v2144_v14  ;;  %v618_v23 = vld [vmem:[#allocation11 + $0x1c8] sm:$0xff] }
 0x1f7   : > { %990 = vmatprep.subr.bf16.mxu1 %v1520_v58  ;;  %v1567_v27 = vcombine.low %v618_v23, %v622_v25  ;;  %v1568_v28 = vcombine.high %v618_v23, %v622_v25  ;;  %v584_v58 = vld [vmem:[#allocation11 + $0xb8] sm:$0xff]  ;;  %v615_v25 = vld [vmem:[#allocation11 + $0x1b0] sm:$0xff] }
 0x1f8   : > { %v1531_v4 = vcombine.low %v580_v57, %v584_v58  ;;  %v1562_v30 = vcombine.high %v611_v24, %v615_v25 }
 0x1fa   : > { %991 = vmatpush1.bf16.msra.mxu1 %v1519_v61  ;;  %v1530_v61 = vcombine.high %v579_v55, %v583_v56 }
 0x1fb   : > { %992 = vmatprep.subr.bf16.mxu1 %v1528_v62  ;;  %v1532_v62 = vcombine.high %v580_v57, %v584_v58 }
 0x1fe   : > { %993 = vmatpush1.bf16.msra.mxu1 %v1527_v1  ;;  %v588_v1 = vld [vmem:[#allocation11 + $0xd8] sm:$0xff] }
 0x1ff   : > { %994 = vmatprep.subr.bf16.mxu1 %v1536_v2  ;;  %v592_v2 = vld [vmem:[#allocation11 + $0xf8] sm:$0xff] }
 0x200   : > { %v1539_v12 = vcombine.low %v588_v1, %v592_v2 }
 0x202   : > { %995 = vmatpush1.bf16.msra.mxu1 %v1535_v5  ;;  %v1538_v5 = vcombine.high %v587_v63, %v591_v0 }
 0x203   : > { %996 = vmatprep.subr.bf16.mxu1 %v1544_v6  ;;  %v1540_v6 = vcombine.high %v588_v1, %v592_v2 }
 0x206   : > { %997 = vmatpush1.bf16.msra.mxu1 %v1543_v9  ;;  %v596_v9 = vld [vmem:[#allocation11 + $0x118] sm:$0xff] }
 0x207   : > { %998 = vmatprep.subr.bf16.mxu1 %v1552_v10  ;;  %v600_v10 = vld [vmem:[#allocation11 + $0x138] sm:$0xff] }
 0x208   : > { %v1548_v15 = vcombine.high %v596_v9, %v600_v10  ;;  %v1547_v21 = vcombine.low %v596_v9, %v600_v10 }
 0x20a   : > { %999 = vmatpush1.bf16.msra.mxu1 %v1551_v11  ;;  %v1537_v11 = vcombine.low %v587_v63, %v591_v0 }
 0x20b   : > { %1000 = vmatprep.subr.bf16.mxu1 %v1560_v20  ;;  %v1545_v20 = vcombine.low %v595_v7, %v599_v8 }
 0x20e   : > { %1001 = vmatpush1.bf16.msra.mxu1 %v1559_v19  ;;  %v608_v19 = vld [vmem:[#allocation11 + $0x178] sm:$0xff] }
 0x20f   : > { %1002 = vmatprep.subr.bf16.mxu1 %v1568_v28  ;;  %v1556_v23 = vcombine.high %v604_v18, %v608_v19  ;;  %v1553_v28 = vcombine.low %v603_v16, %v607_v17  ;;  %v1555_v29 = vcombine.low %v604_v18, %v608_v19  ;;  %v1127_v19 = vcombine.high %v1125_v48, %v1125_v48 }
 0x212   : > { %1003 = vmatpush1.bf16.msra.mxu1 %v1567_v27  ;;  %v616_v27 = vld [vmem:[#allocation11 + $0x1b8] sm:$0xff] }
 0x213   : > { %1074 = vmatprep.subr.bf16.mxu1 %v1516_v36  ;;  %v1564_v31 = vcombine.high %v612_v26, %v616_v27  ;;  %v1561_v36 = vcombine.low %v611_v24, %v615_v25  ;;  %v1563_v37 = vcombine.low %v612_v26, %v616_v27  ;;  %v1292_v25 = vld [vmem:[%s2506_s27] sm:$0xff]  ;;  %v1293_v27 = vld [vmem:[%s2506_s27 + $0x8] sm:$0xff] }
 0x2c8   : > { %v543_v39 = vpop.f32.mrb[0].mxu1 }
 0x2c9   : > { %v1610_v40 = vpop.f32.mrb[1].mxu1 }
 0x2ca   : > { %v546_v42 = vpop.f32.mrb[2].mxu1  ;;  %v1569_v40 = vcombine.low %v619_v32, %v623_v33 }
 0x2cb   : > { %v550_v43 = vpack.c.bf16 %v546_v42, %v543_v39  ;;  %v1611_v45 = vpop.f32.mrb[3].mxu1  ;;  %v2145_v42 = vmov 1966171168  }
 0x2cd   : > { %v559_v51 = vadd.bf16 %v558_v41, %v550_v43  ;;  %v1129_v43 = vunpack.c.l.s4 %v2145_v42 }
 0x2cf   : > { %v2532_v52 = vmax.bf16 %v2144_v14, %v559_v51  ;;  %v1130_v45 = vunpack.c.0.s8 %v1129_v43 }
 0x2d1   : > { %978 = vmatmul.mubr.bf16.vlgmr.msra.gmra.mrb[4].mxu0 %v2532_v52  ;;  %1021 = vmatmul.mubr.bf16.vlgmr.msra.gmra.mrb[4].mxu1 %v2532_v52  ;;  %v1133_v46 = vsub.s32 %v1130_v45, %v2522_v44 }
 0x2d2   : > { %1032 = vmatpush1.bf16.msra.mxu0 %v1513_v34  ;;  %1075 = vmatpush1.bf16.msra.mxu1 %v1515_v35  ;;  %v620_v34 = vld [vmem:[#allocation11 + $0x1d8] sm:$0xff] }
 0x2d3   : > { %1033 = vmatprep.subr.bf16.mxu0 %v1522_v53  ;;  %1076 = vmatprep.subr.bf16.mxu1 %v1524_v54  ;;  %v624_v35 = vld [vmem:[#allocation11 + $0x1f8] sm:$0xff]  ;;  %v1134_v49 = vrot.slane %v1125_v48, %v1133_v46 }
 0x2d4   : > { %1063 = vmatprep.mubr.bf16.mxu0 %v2144_v14  ;;  %1106 = vmatprep.mubr.bf16.mxu1 %v2144_v14  ;;  %v1572_v39 = vcombine.high %v620_v34, %v624_v35  ;;  %v1571_v41 = vcombine.low %v620_v34, %v624_v35 }
 0x2d5   : > { %v1142_v50 = vcombine.high %v1134_v49, %v1134_v49  ;;  %v1150_v51 = vrot.slane %v1134_v49, %v1133_v46 }
 0x2d6   : > { %1034 = vmatpush1.bf16.msra.mxu0 %v1521_v59  ;;  %1077 = vmatpush1.bf16.msra.mxu1 %v1523_v60 }
 0x2d7   : > { %1035 = vmatprep.subr.bf16.mxu0 %v1530_v61  ;;  %1078 = vmatprep.subr.bf16.mxu1 %v1532_v62  ;;  %v1164_v53 = vrot.slane %v1142_v50, %v1133_v46  ;;  %v1172_v54 = vcombine.high %v1150_v51, %v1150_v51  ;;  %v1177_v56 = vpack.i.b16 %v1150_v51, %v1150_v51 }
 0x2d9   : > { %v1174_v55 = vcombine.high %v1164_v53, %v1164_v53  ;;  %v1191_v57 = vpack.i.b16 %v1172_v54, %v1172_v54  ;;  %v1184_v58 = vpack.i.b16 %v1164_v53, %v1164_v53  ;;  %v1182_v63 = vrot.slane %v1177_v56, %v2525_v47 }
 0x2da   : > { %1036 = vmatpush1.bf16.msra.mxu0 %v1529_v3  ;;  %1079 = vmatpush1.bf16.msra.mxu1 %v1531_v4 }
 0x2db   : > { %1037 = vmatprep.subr.bf16.mxu0 %v1538_v5  ;;  %1080 = vmatprep.subr.bf16.mxu1 %v1540_v6  ;;  %v1198_v59 = vpack.i.b16 %v1174_v55, %v1174_v55  ;;  %v1196_v0 = vrot.slane %v1191_v57, %v2525_v47  ;;  %v1189_v2 = vrot.slane %v1184_v58, %v2525_v47 }
 0x2dd   : > { %v1203_v3 = vrot.slane %v1198_v59, %v2525_v47 }
 0x2de   : > { %1038 = vmatpush1.bf16.msra.mxu0 %v1537_v11  ;;  %1081 = vmatpush1.bf16.msra.mxu1 %v1539_v12 }
 0x2df   : > { %1039 = vmatprep.subr.bf16.mxu0 %v1546_v13  ;;  %1082 = vmatprep.subr.bf16.mxu1 %v1548_v15 }
 0x2e2   : > { %1040 = vmatpush1.bf16.msra.mxu0 %v1545_v20  ;;  %1083 = vmatpush1.bf16.msra.mxu1 %v1547_v21 }
 0x2e3   : > { %1041 = vmatprep.subr.bf16.mxu0 %v1554_v22  ;;  %1084 = vmatprep.subr.bf16.mxu1 %v1556_v23 }
 0x2e6   : > { %1042 = vmatpush1.bf16.msra.mxu0 %v1553_v28  ;;  %1085 = vmatpush1.bf16.msra.mxu1 %v1555_v29  ;;  %v1294_v28 = vld [vmem:[%s2506_s27 + $0x10] sm:$0xff]  ;;  %v1295_v29 = vld [vmem:[%s2506_s27 + $0x18] sm:$0xff] }
 0x2e7   : > { %1043 = vmatprep.subr.bf16.mxu0 %v1562_v30  ;;  %1086 = vmatprep.subr.bf16.mxu1 %v1564_v31  ;;  %v1141_v30 = vrot.slane %v1127_v19, %v1133_v46 }
 0x2ea   : > { %1044 = vmatpush1.bf16.msra.mxu0 %v1561_v36  ;;  %1087 = vmatpush1.bf16.msra.mxu1 %v1563_v37 }
 0x2eb   : > { %1045 = vmatprep.subr.bf16.mxu0 %v1570_v38  ;;  %1088 = vmatprep.subr.bf16.mxu1 %v1572_v39  ;;  %v1143_v39 = vcombine.high %v1141_v30, %v1141_v30 }
 0x2ee   : > { %1046 = vmatpush1.bf16.msra.mxu0 %v1569_v40  ;;  %1089 = vmatpush1.bf16.msra.mxu1 %v1571_v41  ;;  %v1157_v40 = vrot.slane %v1141_v30, %v1133_v46  ;;  %v1171_v41 = vrot.slane %v1143_v39, %v1133_v46 }
 0x2f0   : > { %v1173_v42 = vcombine.high %v1157_v40, %v1157_v40  ;;  %v1175_v43 = vcombine.high %v1171_v41, %v1171_v41  ;;  %v1205_v45 = vpack.i.b16 %v1157_v40, %v1157_v40  ;;  %v1212_v49 = vpack.i.b16 %v1171_v41, %v1171_v41 }
 0x2f1   : > { %1064 = vmatmul.mubr.bf16.vlgmr.msra.gmra.mrb[8].mxu0 %v2532_v52  ;;  %1107 = vmatmul.mubr.bf16.vlgmr.msra.gmra.mrb[8].mxu1 %v2532_v52 }
 0x2f2   : > { %v1219_v48 = vpack.i.b16 %v1173_v42, %v1173_v42  ;;  %v1226_v50 = vpack.i.b16 %v1175_v43, %v1175_v43  ;;  %v1210_v56 = vrot.slane %v1205_v45, %v2525_v47 }
 0x2f4   : > { %v1224_v57 = vrot.slane %v1219_v48, %v2525_v47  ;;  %v1231_v46 = vrot.slane %v1226_v50, %v2525_v47 }
 0x3a4   : > { %v979_v60 = vpop.f32.mrb[4].mxu0  ;;  %v1022_v61 = vpop.f32.mrb[4].mxu1 }
 0x3a5   : > { %v981_v62 = vpop.f32.mrb[5].mxu0  ;;  %v1024_v52 = vpop.f32.mrb[5].mxu1 }
 0x3a6   : > { %v983_v44 = vpop.f32.mrb[6].mxu0  ;;  %v1026_v1 = vpop.f32.mrb[6].mxu1 }
 0x3a7   : > { %v1117_v4 = vpack.c.bf16 %v983_v44, %v979_v60  ;;  %v1119_v5 = vpack.c.bf16 %v1026_v1, %v1022_v61  ;;  %v985_v6 = vpop.f32.mrb[7].mxu0  ;;  %v1028_v7 = vpop.f32.mrb[7].mxu1  ;;  %v1217_v60 = vrot.slane %v1212_v49, %v2525_v47 }
 0x3a8   : > { %v1118_v8 = vpack.c.bf16 %v985_v6, %v981_v62  ;;  %v1120_v9 = vpack.c.bf16 %v1028_v7, %v1024_v52 }
 0x3a9   : > { %v1232_v10 = vadd.bf16 %v1182_v63, %v1117_v4  ;;  %v1234_v11 = vadd.bf16 %v1196_v0, %v1119_v5 }
 0x3aa   : > { %v1233_v12 = vadd.bf16 %v1189_v2, %v1118_v8  ;;  %v1235_v13 = vadd.bf16 %v1203_v3, %v1120_v9 }
 0x3ab   : > { %v1240_v15 = vmax.bf16 %v2144_v14, %v1232_v10  ;;  %v1242_v16 = vmax.bf16 %v2144_v14, %v1234_v11 }
 0x3ac   : > { %v1241_v17 = vmax.bf16 %v2144_v14, %v1233_v12  ;;  %v1243_v18 = vmax.bf16 %v2144_v14, %v1235_v13  ;;  %v1296_v13 = vld [vmem:[%s2506_s27 + $0x20] sm:$0xff] }
 0x3ae   : > { %v1573_v20 = vcombine.low %v1240_v15, %v1241_v17  ;;  %v1577_v21 = vcombine.high %v1240_v15, %v1241_v17  ;;  %v1574_v22 = vcombine.low %v1242_v16, %v1243_v18  ;;  %v1578_v23 = vcombine.high %v1242_v16, %v1243_v18  ;;  %v1297_v16 = vld [vmem:[%s2506_s27 + $0x28] sm:$0xff]  ;;  %v1298_v17 = vld [vmem:[%s2506_s27 + $0x30] sm:$0xff]  ;;  %v1299_v18 = vld [vmem:[%s2506_s27 + $0x38] sm:$0xff] }
 0x3b0   : > { %v1288_v24 = vmax.bf16 %v1577_v21, %v1573_v20  ;;  %v1289_v26 = vmax.bf16 %v1578_v23, %v1574_v22 }
 0x3b2   : > { %v1300_v31 = vunpack.c.l.bf16 %v1288_v24  ;;  %v1301_v32 = vunpack.c.h.bf16 %v1288_v24  ;;  %v1302_v33 = vunpack.c.l.bf16 %v1289_v26  ;;  %v1303_v34 = vunpack.c.h.bf16 %v1289_v26 }
 0x3b4   : > { %v1308_v35 = vmax.f32 %v1292_v25, %v1300_v31  ;;  %v1309_v36 = vmax.f32 %v1293_v27, %v1301_v32  ;;  %v1310_v37 = vmax.f32 %v1294_v28, %v1302_v33  ;;  %v1311_v38 = vmax.f32 %v1295_v29, %v1303_v34 }
 0x3b6   : > { %1316 = vst [vmem:[%s2506_s27] sm:$0xff] %v1308_v35  ;;  %1317 = vst [vmem:[%s2506_s27 + $0x8] sm:$0xff] %v1309_v36 }
 0x3b7   : > { %1318 = vst [vmem:[%s2506_s27 + $0x10] sm:$0xff] %v1310_v37  ;;  %1319 = vst [vmem:[%s2506_s27 + $0x18] sm:$0xff] %v1311_v38 }
 0x3c4   : > { %v1065_v51 = vpop.f32.mrb[8].mxu0  ;;  %v1108_v53 = vpop.f32.mrb[8].mxu1 }
 0x3c5   : > { %v1067_v54 = vpop.f32.mrb[9].mxu0  ;;  %v1110_v55 = vpop.f32.mrb[9].mxu1 }
 0x3c6   : > { %v1069_v58 = vpop.f32.mrb[10].mxu0  ;;  %v1112_v59 = vpop.f32.mrb[10].mxu1 }
 0x3c7   : > { %v1121_v61 = vpack.c.bf16 %v1069_v58, %v1065_v51  ;;  %v1123_v62 = vpack.c.bf16 %v1112_v59, %v1108_v53  ;;  %v1071_v52 = vpop.f32.mrb[11].mxu0  ;;  %v1114_v63 = vpop.f32.mrb[11].mxu1 }
 0x3c8   : > { %v1122_v0 = vpack.c.bf16 %v1071_v52, %v1067_v54  ;;  %v1124_v44 = vpack.c.bf16 %v1114_v63, %v1110_v55 }
 0x3c9   : > { %v1236_v1 = vadd.bf16 %v1210_v56, %v1121_v61  ;;  %v1238_v2 = vadd.bf16 %v1224_v57, %v1123_v62 }
 0x3ca   : > { %v1237_v3 = vadd.bf16 %v1217_v60, %v1122_v0  ;;  %v1239_v4 = vadd.bf16 %v1231_v46, %v1124_v44 }
 0x3cb   : > { %v1244_v5 = vmax.bf16 %v2144_v14, %v1236_v1  ;;  %v1246_v47 = vmax.bf16 %v2144_v14, %v1238_v2 }
 0x3cc   : > { %v1245_v6 = vmax.bf16 %v2144_v14, %v1237_v3  ;;  %v1247_v7 = vmax.bf16 %v2144_v14, %v1239_v4 }
 0x3ce   : > { %v1575_v8 = vcombine.low %v1244_v5, %v1245_v6  ;;  %v1579_v9 = vcombine.high %v1244_v5, %v1245_v6  ;;  %v1576_v10 = vcombine.low %v1246_v47, %v1247_v7  ;;  %v1580_v11 = vcombine.high %v1246_v47, %v1247_v7 }
 0x3d0   : > { %v1290_v12 = vmax.bf16 %v1579_v9, %v1575_v8  ;;  %v1291_v15 = vmax.bf16 %v1580_v11, %v1576_v10 }
 0x3d2   : > { %v1304_v19 = vunpack.c.l.bf16 %v1290_v12  ;;  %v1305_v20 = vunpack.c.h.bf16 %v1290_v12  ;;  %v1306_v14 = vunpack.c.l.bf16 %v1291_v15  ;;  %v1307_v21 = vunpack.c.h.bf16 %v1291_v15 }
 0x3d4   : > { %v1312_v22 = vmax.f32 %v1296_v13, %v1304_v19  ;;  %v1313_v23 = vmax.f32 %v1297_v16, %v1305_v20  ;;  %v1314_v24 = vmax.f32 %v1298_v17, %v1306_v14  ;;  %v1315_v25 = vmax.f32 %v1299_v18, %v1307_v21 }
 0x3d6   : > { %1320 = vst [vmem:[%s2506_s27 + $0x20] sm:$0xff] %v1312_v22  ;;  %1321 = vst [vmem:[%s2506_s27 + $0x28] sm:$0xff] %v1313_v23 }
 0x3d7   : > { %1322 = vst [vmem:[%s2506_s27 + $0x30] sm:$0xff] %v1314_v24  ;;  %1323 = vst [vmem:[%s2506_s27 + $0x38] sm:$0xff] %v1315_v25 }
 0x3d8   : > { %2004 = shalt.err (!%p2001_p3)
}
 0x3d9   : > { %s2005_s4 = scalar_lea.hbm %s2574_s30, 1024  ;;  %s2009_s13 = scalar_lea.hbm %s2690_s16, 2048 }
 0x3da   : > { %p2006_p12 = scmp.ne.s32.totalorder %s2574_s30, %s2005_s4  ;;  %p2010_p1 = scmp.lt.u32.totalorder %s2574_s30, %s2690_s16 }
 0x3db   : > { %p2011_p2 = scmp.lt.u32.totalorder %s2009_s13, %s2005_s4  ;;  %p2013_p8 = scmp.lt.u32.totalorder %s2005_s4, %s2574_s30 }
 0x3dc   : > { %p2007_p13 = pnand %p2006_p12, %p2691_p5 }
 0x3dd   : > { %p2012_p10 = por %p2011_p2, %p2010_p1 }
 0x3de   : > { %p2008_p0 = pneg %p2007_p13 }
 0x3df   : > { %p2014_p11 = por %p2013_p8, %p2012_p10 }
 0x3e1   : > { %p2015_p4 = pnand %p2014_p11, %p2008_p0 }
 0x3e3   : > { %2018 = shalt.err (!%p2015_p4)
}
 0x3e4   : > { %1639 = dma.vmem_to_hbm [thread:$0]  (%p2691_p5), %s2576_s18, 1024, %s2574_s30, %s1325_s8  }
 0x3e5 PF: > { %s2692_s23 = sld [smem:[#allocation20_spill]]  ;;  %p1681_p7 = scmp.ge.s32.totalorder %s2125_s11, 2 }
 0x3e6   : > { %p2693_p6 = scmp.ne.s32.totalorder %s2682_s15, 0 }
 0x3e8   : > { %p1665_p9 = pnand %p1681_p7, %p2693_p6 }
 0x3eb   : > { %s1351_s17 = sand.u32 1, %s2692_s23  }
 0x3ec   : > { %s1352_s12 = scalar_lea.sflag [#allocation4], %s1351_s17 }
 0x3ed   : > { %2080 = dma.done.wait (!%p1665_p9), %s1352_s12, 1024  }
 0x3ee   : > { %2082 = vsyncadd (!%p1665_p9), %s1352_s12, 4294966272  ;;  %s26_s11 = sadd.s32 1, %s2125_s11   ;;  %s2694_s24 = smov %s2089_s25 }
 0x3ef   : > { %p23_p3 = scmp.ge.s32.totalorder %s26_s11, 8   ;;  %s2695_s25 = smov %s2093_s26 }
 0x3f0   : > { %s2696_s26 = smov %s2425_s1  ;;  %s2697_s27 = smov %s2101_s28 }
 0x3f1   : > { %s2698_s28 = smov %s2105_s29  ;;  %s2699_s29 = smov %s2428_s14 }
 0x3f2   : > { %s2700_s30 = smov %s2117_s9  ;;  %s2701_s8 = smov %s2121_s10 }
 0x3f3   : > { %s2702_s9 = smov %s2705_s19  ;;  %s2703_s10 = smov %s2709_s22 }
 0x3f4   :  { %25 = sbr.rel (!%p23_p3) target bundleno = 19 (0x13), region = 121 }
 0x3fb   :  { %1357 = vsyncpa [#allocation3], 1 }
 0x3fc   :  { %1359 = vsyncpa [#allocation3 + $0x1], 1 }
 0x3fd   :  { %1360 = vsyncpa [#allocation6], 1 }
 0x3fe   :  { %1361 = vsyncpa [#allocation9], 1 }
 0x3ff   :  { %1362 = vsyncpa [#allocation12], 1 }
 0x400   :  { %1363 = vsyncpa [#allocation4], 1 }
 0x401   :  { %1365 = vsyncpa [#allocation4 + $0x1], 1 }

</bundles_post_ra>
